<compile_context>
chip_gen: v5e
topology: v5e:2x2
jax: 0.10.0
libtpu: 0.0.40
codegen_flags: <defaults>
</compile_context>

<pallas_src>
import functools

import jax
import jax.numpy as jnp
from jax.experimental import pallas as pl
from jax.experimental.pallas import tpu as pltpu


def _round_up(x, m):
    return ((x + m - 1) // m) * m


def _critic_kernel(s_ref, a_ref, w1_ref, w2_ref, misc_ref, o_ref, *, input_dim):
    """One batch tile of the critic MLP.

    misc_ref rows: 0 = b1, 1 = b2, 2 = w3 (output weight as a row), 3 = [b3, 0, ...].
    """
    b1 = misc_ref[0:1, :]
    b2 = misc_ref[1:2, :]
    w3 = misc_ref[2:3, :]
    b3 = misc_ref[3:4, 0:1]

    # Layer 1: cat([state, action], dim=1) @ W1 + b1, realized with static
    # row-slices of the combined weight (aligned slices -> free views).
    h = (jnp.dot(s_ref[...], w1_ref[:input_dim, :],
                 preferred_element_type=jnp.float32)
         + jnp.dot(a_ref[...], w1_ref[input_dim:, :],
                   preferred_element_type=jnp.float32)
         + b1)
    h = jnp.maximum(h, 0.0)                                   # ReLU (f32)

    # Layer 2 (cast activations to the weight dtype so bf16 weights hit the
    # bf16 MXU path; accumulation stays f32).
    h = jnp.dot(h.astype(w2_ref.dtype), w2_ref[...],
                preferred_element_type=jnp.float32) + b2
    h = jnp.maximum(h, 0.0)                                   # ReLU (f32)

    # Output layer (N=1): VPU multiply + XLU lane reduction instead of an MXU
    # pass with 127/128 masked output lanes.
    q = jnp.sum(h * w3, axis=-1, keepdims=True) + b3
    o_ref[...] = q.astype(o_ref.dtype)


def critic_forward(state, action, params, *, use_bf16=False, batch_tile=512):
    """Critic MLP forward pass as one Pallas kernel call.

    state:  [B, input_dim]  float32
    action: [B, output_dim] float32
    params: dict with
        w1   [input_dim + output_dim, Hp]   (pre-transposed, hidden padded to Hp)
        w2   [Hp, Hp]
        misc [4, Hp]  rows = b1, b2, w3-row, [b3, 0, ...]
    returns: [B, 1] float32
    """
    B, input_dim = state.shape
    output_dim = action.shape[1]

    w1 = params["w1"]
    w2 = params["w2"]
    misc = params["misc"]
    if use_bf16:
        # bf16 matmul inputs (v6e/v7x MXU); biases / elementwise stay f32.
        state = state.astype(jnp.bfloat16)
        action = action.astype(jnp.bfloat16)
        w1 = w1.astype(jnp.bfloat16)
        w2 = w2.astype(jnp.bfloat16)

    in1, Hp = w1.shape
    assert in1 == input_dim + output_dim

    # Batch tile: full batch if it fits a single block, else 512-row tiles
    # (double-buffered over B; weights stay resident via constant index_maps).
    tb = B if B <= batch_tile else batch_tile
    grid = (pl.cdiv(B, tb),)

    flops = 2 * B * (in1 * Hp + Hp * Hp + Hp)
    bytes_accessed = (state.nbytes + action.nbytes + w1.nbytes + w2.nbytes
                      + misc.nbytes + B * 4)

    kernel = functools.partial(_critic_kernel, input_dim=input_dim)

    return pl.pallas_call(
        kernel,
        out_shape=jax.ShapeDtypeStruct((B, 1), jnp.float32),
        grid=grid,
        in_specs=[
            pl.BlockSpec((tb, input_dim), lambda i: (i, 0)),
            pl.BlockSpec((tb, output_dim), lambda i: (i, 0)),
            pl.BlockSpec((in1, Hp), lambda i: (0, 0)),
            pl.BlockSpec((Hp, Hp), lambda i: (0, 0)),
            pl.BlockSpec((4, Hp), lambda i: (0, 0)),
        ],
        out_specs=pl.BlockSpec((tb, 1), lambda i: (i, 0)),
        compiler_params=pltpu.CompilerParams(
            dimension_semantics=("parallel",)),
        cost_estimate=pl.CostEstimate(
            flops=flops, transcendentals=0, bytes_accessed=bytes_accessed),
    )(state, action, w1, w2, misc)


def init_critic_params(key, input_dim, hidden_dims, output_dim):
    """PyTorch-Linear-style init (uniform +/- 1/sqrt(fan_in)), weights stored
    [in_features, out_features], hidden width zero-padded to a multiple of 128."""
    assert len(hidden_dims) == 2, "module is wired as a 2-hidden-layer MLP"
    h0, h1 = hidden_dims
    in1 = input_dim + output_dim
    Hp = max(_round_up(h0, 128), _round_up(h1, 128))
    ks = jax.random.split(key, 6)

    def u(k, shape, fan_in):
        bound = 1.0 / jnp.sqrt(jnp.float32(fan_in))
        return jax.random.uniform(k, shape, jnp.float32, -bound, bound)

    # Logical (PyTorch-equivalent) parameters.
    w1 = u(ks[0], (in1, h0), in1)
    b1 = u(ks[1], (h0,), in1)
    w2 = u(ks[2], (h0, h1), h0)
    b2 = u(ks[3], (h1,), h0)
    w3 = u(ks[4], (h1,), h1)          # final-layer weight stored as a row
    b3 = u(ks[5], (), h1)

    # Zero-pad to lane-dense width Hp (padding contributes exactly 0).
    w1_p = jnp.zeros((in1, Hp), jnp.float32).at[:, :h0].set(w1)
    w2_p = jnp.zeros((Hp, Hp), jnp.float32).at[:h0, :h1].set(w2)
    misc = jnp.zeros((4, Hp), jnp.float32)
    misc = misc.at[0, :h0].set(b1)
    misc = misc.at[1, :h1].set(b2)
    misc = misc.at[2, :h1].set(w3)
    misc = misc.at[3, 0].set(b3)
    return {"w1": w1_p, "w2": w2_p, "misc": misc}


def critic_reference(state, action, params):
    """Pure-JAX reference matching the PyTorch module (same padded params)."""
    x = jnp.concatenate([state, action], axis=1)
    h = jnp.maximum(x @ params["w1"] + params["misc"][0:1, :], 0.0)
    h = jnp.maximum(h @ params["w2"] + params["misc"][1:2, :], 0.0)
    return (jnp.sum(h * params["misc"][2:3, :], axis=-1, keepdims=True)
            + params["misc"][3, 0])


if __name__ == "__main__":
    # Small shapes consistent with the module: state_dim=16, action_dim=8,
    # hidden_dims=[32, 32], batch=8.
    B, input_dim, output_dim = 8, 16, 8
    hidden_dims = (32, 32)

    key = jax.random.PRNGKey(0)
    k_s, k_a, k_p = jax.random.split(key, 3)
    state = jax.random.normal(k_s, (B, input_dim), jnp.float32)
    action = jax.random.normal(k_a, (B, output_dim), jnp.float32)
    params = init_critic_params(k_p, input_dim, hidden_dims, output_dim)

    # f32 path: exact match against the reference.
    q = jax.block_until_ready(critic_forward(state, action, params))
    q_ref = critic_reference(state, action, params)
    assert q.shape == (B, 1), q.shape
    assert jnp.allclose(q, q_ref, atol=1e-5, rtol=1e-5), (
        f"f32 mismatch: max abs err {jnp.max(jnp.abs(q - q_ref))}")

    # bf16-matmul path (v6e/v7x): f32 accumulation, loose tolerance.
    q_bf16 = jax.block_until_ready(
        critic_forward(state, action, params, use_bf16=True))
    assert jnp.allclose(q_bf16, q_ref, atol=1e-1, rtol=1e-1), (
        f"bf16 mismatch: max abs err {jnp.max(jnp.abs(q_bf16 - q_ref))}")

    print("KERNEL_OK")
</pallas_src>

<mosaic_0001>
module attributes {stable_mosaic.version = 11 : i64} {
  func.func @_critic_kernel(%arg0: i32, %arg1: memref<8x16xf32, #tpu.memory_space<vmem>>, %arg2: memref<8x8xf32, #tpu.memory_space<vmem>>, %arg3: memref<24x128xf32, #tpu.memory_space<vmem>>, %arg4: memref<128x128xf32, #tpu.memory_space<vmem>>, %arg5: memref<4x128xf32, #tpu.memory_space<vmem>>, %arg6: memref<8x1xf32, #tpu.memory_space<vmem>>) attributes {dimension_semantics = [#tpu.dimension_semantics<parallel>], iteration_bounds = array<i64: 1>, scalar_prefetch = 0 : i64, scratch_operands = 0 : i64, tpu.core_type = #tpu.core_type<tc>, window_params = [{transform_indices = @transform_0, window_bounds = array<i64: 8, 16>}, {transform_indices = @transform_1, window_bounds = array<i64: 8, 8>}, {pipeline_mode = #tpu.pipeline_mode<synchronous>, transform_indices = @transform_2, window_bounds = array<i64: 24, 128>}, {pipeline_mode = #tpu.pipeline_mode<synchronous>, transform_indices = @transform_3, window_bounds = array<i64: 128, 128>}, {pipeline_mode = #tpu.pipeline_mode<synchronous>, transform_indices = @transform_4, window_bounds = array<i64: 4, 128>}, {transform_indices = @transform_5, window_bounds = array<i64: 8, 1>}]} {
    %c0 = arith.constant 0 : index
    %c0_0 = arith.constant 0 : index
    %0 = vector.load %arg5[%c0, %c0_0] : memref<4x128xf32, #tpu.memory_space<vmem>>, vector<1x128xf32>
    %c1 = arith.constant 1 : index
    %c0_1 = arith.constant 0 : index
    %1 = vector.load %arg5[%c1, %c0_1] : memref<4x128xf32, #tpu.memory_space<vmem>>, vector<1x128xf32>
    %c2 = arith.constant 2 : index
    %c0_2 = arith.constant 0 : index
    %2 = vector.load %arg5[%c2, %c0_2] : memref<4x128xf32, #tpu.memory_space<vmem>>, vector<1x128xf32>
    %c3 = arith.constant 3 : index
    %c0_3 = arith.constant 0 : index
    %3 = vector.load %arg5[%c3, %c0_3] : memref<4x128xf32, #tpu.memory_space<vmem>>, vector<1x1xf32>
    %c0_4 = arith.constant 0 : index
    %c0_5 = arith.constant 0 : index
    %4 = vector.load %arg1[%c0_4, %c0_5] : memref<8x16xf32, #tpu.memory_space<vmem>>, vector<8x16xf32>
    %c0_6 = arith.constant 0 : index
    %c0_7 = arith.constant 0 : index
    %5 = vector.load %arg3[%c0_6, %c0_7] : memref<24x128xf32, #tpu.memory_space<vmem>>, vector<16x128xf32>
    %cst = arith.constant dense<0.000000e+00> : vector<8x128xf32>
    %6 = tpu.matmul %4, %5, %cst {dimension_numbers = #tpu.dot_dimension_numbers<[1], [0], [0], [1], [0, 0, 1, 1], [], []>} : vector<8x16xf32>, vector<16x128xf32>, vector<8x128xf32> -> vector<8x128xf32>
    %c0_8 = arith.constant 0 : index
    %c0_9 = arith.constant 0 : index
    %7 = vector.load %arg2[%c0_8, %c0_9] : memref<8x8xf32, #tpu.memory_space<vmem>>, vector<8x8xf32>
    %c16 = arith.constant 16 : index
    %c0_10 = arith.constant 0 : index
    %8 = vector.load %arg3[%c16, %c0_10] : memref<24x128xf32, #tpu.memory_space<vmem>>, vector<8x128xf32>
    %cst_11 = arith.constant dense<0.000000e+00> : vector<8x128xf32>
    %9 = tpu.matmul %7, %8, %cst_11 {dimension_numbers = #tpu.dot_dimension_numbers<[1], [0], [0], [1], [0, 0, 1, 1], [], []>} : vector<8x8xf32>, vector<8x128xf32>, vector<8x128xf32> -> vector<8x128xf32>
    %10 = arith.addf %6, %9 : vector<8x128xf32>
    %11 = vector.broadcast %0 : vector<1x128xf32> to vector<8x128xf32>
    %12 = arith.addf %10, %11 : vector<8x128xf32>
    %cst_12 = arith.constant 0.000000e+00 : f32
    %13 = vector.broadcast %cst_12 : f32 to vector<8x128xf32>
    %14 = arith.maximumf %12, %13 : vector<8x128xf32>
    %c0_13 = arith.constant 0 : index
    %c0_14 = arith.constant 0 : index
    %15 = vector.load %arg4[%c0_13, %c0_14] : memref<128x128xf32, #tpu.memory_space<vmem>>, vector<128x128xf32>
    %cst_15 = arith.constant dense<0.000000e+00> : vector<8x128xf32>
    %16 = tpu.matmul %14, %15, %cst_15 {dimension_numbers = #tpu.dot_dimension_numbers<[1], [0], [0], [1], [0, 0, 1, 1], [], []>} : vector<8x128xf32>, vector<128x128xf32>, vector<8x128xf32> -> vector<8x128xf32>
    %17 = vector.broadcast %1 : vector<1x128xf32> to vector<8x128xf32>
    %18 = arith.addf %16, %17 : vector<8x128xf32>
    %cst_16 = arith.constant 0.000000e+00 : f32
    %19 = vector.broadcast %cst_16 : f32 to vector<8x128xf32>
    %20 = arith.maximumf %18, %19 : vector<8x128xf32>
    %21 = vector.broadcast %2 : vector<1x128xf32> to vector<8x128xf32>
    %22 = arith.mulf %20, %21 : vector<8x128xf32>
    %cst_17 = arith.constant dense<0.000000e+00> : vector<8xf32>
    %23 = vector.multi_reduction <add>, %22, %cst_17 [1] : vector<8x128xf32> to vector<8xf32>
    %24 = vector.shape_cast %23 : vector<8xf32> to vector<8x1xf32>
    %25 = vector.broadcast %3 : vector<1x1xf32> to vector<8x1xf32>
    %26 = arith.addf %24, %25 : vector<8x1xf32>
    %c0_18 = arith.constant 0 : index
    %c0_19 = arith.constant 0 : index
    %27 = vector.load %arg6[%c0_18, %c0_19] : memref<8x1xf32, #tpu.memory_space<vmem>>, vector<8x1xf32>
    tpu.vector_store %arg6[%c0_18, %c0_19], %26 {strides = array<i32>} : memref<8x1xf32, #tpu.memory_space<vmem>>, vector<8x1xf32>,
    return
  }
  func.func @transform_0(%arg0: i32) -> (i32, i32) {
    %c0_i32 = arith.constant 0 : i32
    %c0_i32_0 = arith.constant 0 : i32
    return %arg0, %c0_i32 : i32, i32
  }
  func.func @transform_1(%arg0: i32) -> (i32, i32) {
    %c0_i32 = arith.constant 0 : i32
    %c0_i32_0 = arith.constant 0 : i32
    return %arg0, %c0_i32 : i32, i32
  }
  func.func @transform_2(%arg0: i32) -> (i32, i32) {
    %c0_i32 = arith.constant 0 : i32
    %c0_i32_0 = arith.constant 0 : i32
    %c0_i32_1 = arith.constant 0 : i32
    return %c0_i32, %c0_i32_0 : i32, i32
  }
  func.func @transform_3(%arg0: i32) -> (i32, i32) {
    %c0_i32 = arith.constant 0 : i32
    %c0_i32_0 = arith.constant 0 : i32
    %c0_i32_1 = arith.constant 0 : i32
    return %c0_i32, %c0_i32_0 : i32, i32
  }
  func.func @transform_4(%arg0: i32) -> (i32, i32) {
    %c0_i32 = arith.constant 0 : i32
    %c0_i32_0 = arith.constant 0 : i32
    %c0_i32_1 = arith.constant 0 : i32
    return %c0_i32, %c0_i32_0 : i32, i32
  }
  func.func @transform_5(%arg0: i32) -> (i32, i32) {
    %c0_i32 = arith.constant 0 : i32
    %c0_i32_0 = arith.constant 0 : i32
    return %arg0, %c0_i32 : i32, i32
  }
}

</mosaic_0001>

<bundles_post_ra>
// kernel: tpu_custom_call.1
= control target key start
LH: loop header
LB: loop body
LE: loop exit
PB: predicated region body
PF: predicated region fallthrough
CT: control target
= control target key end

     0   :  { %10 = vsyncpa [#allocation3], 0  ;;  %s399_s0 = inlined_call_operand.hbm [shape: f32[8,16], index: 0, kind: input, shape index: {}]   ;;  %s400_s1 = inlined_call_operand.hbm [shape: f32[8,8], index: 1, kind: input, shape index: {}]   ;;  %s401_s2 = inlined_call_operand.hbm [shape: f32[24,128], index: 2, kind: input, shape index: {}]   ;;  %s402_s3 = inlined_call_operand.hbm [shape: f32[128,128], index: 3, kind: input, shape index: {}]   ;;  %s403_s4 = inlined_call_operand.hbm [shape: f32[4,128], index: 4, kind: input, shape index: {}]   ;;  %s404_s5 = inlined_call_operand.vmem [shape: f32[8,1], index: 5, kind: output, shape index: {}]  }
   0x1   :  { %11 = vsyncpa [#allocation5], 0  ;;  %s29_s20 = sshll.u32 %s400_s1, 4  ;;  %s30_s20 = int_to_ptr.hbm [resolvable:$true] %s29_s20 }
   0x2   :  { %12 = vsyncpa [#allocation8], 0  ;;  %s344_s21 = smov [#allocation4]   ;;  %s52_s25 = sshll.u32 %s402_s3, 4  ;;  %s53_s25 = int_to_ptr.hbm [resolvable:$true] %s52_s25 }
   0x3   :  { %s31_s22 = sshll.u32 %s344_s21, 4  ;;  %s345_s26 = smov [#allocation7]   ;;  %s32_s22 = int_to_ptr.vmem [resolvable:$true] %s31_s22 }
   0x4   :  { %34 = dma.hbm_to_vmem [thread:$0]  %s30_s20, 128, %s32_s22, [#allocation5]  }
   0x5   :  { %s54_s27 = sshll.u32 %s345_s26, 4  ;;  %s18_s30 = sshll.u32 %s399_s0, 4  ;;  %s55_s27 = int_to_ptr.vmem [resolvable:$true] %s54_s27  ;;  %s19_s30 = int_to_ptr.hbm [resolvable:$true] %s18_s30 }
   0x6   :  { %s346_s1 = smov 128   ;;  %s347_s6 = smov 8  }
   0x7   :  { %60 = dma.hbm_to_vmem [thread:$0]  %s53_s25, 2048, %s55_s27, [#allocation8], %s346_s1, %s346_s1, %s347_s6  }
   0x8   :  { %s39_s9 = sshll.u32 %s401_s2, 4  ;;  %s348_s10 = smov [#allocation2]   ;;  %s40_s9 = int_to_ptr.hbm [resolvable:$true] %s39_s9 }
   0x9   :  { %s20_s11 = sshll.u32 %s348_s10, 4  ;;  %s349_s3 = smov [#allocation6]   ;;  %s21_s11 = int_to_ptr.vmem [resolvable:$true] %s20_s11 }
   0xa   :  { %23 = dma.hbm_to_vmem [thread:$0]  %s19_s30, 128, %s21_s11, [#allocation3]  }
   0xb   :  { %s41_s12 = sshll.u32 %s349_s3, 4  ;;  %s66_s0 = sshll.u32 %s403_s4, 4  ;;  %s42_s12 = int_to_ptr.vmem [resolvable:$true] %s41_s12  ;;  %s67_s0 = int_to_ptr.hbm [resolvable:$true] %s66_s0 }
   0xc   :  { %47 = dma.hbm_to_vmem [thread:$0]  %s40_s9, 384, %s42_s12, [#allocation5], %s346_s1, %s346_s1, %s347_s6  }
   0xd   :  { %s350_s15 = smov [#allocation9]  }
   0xe   :  { %s68_s16 = sshll.u32 %s350_s15, 4  ;;  %s69_s16 = int_to_ptr.vmem [resolvable:$true] %s68_s16 }
   0xf   :  { %71 = dma.hbm_to_vmem [thread:$0]  %s67_s0, 64, %s69_s16, [#allocation8]  }
  0x10   :  { %338 = dma.done.wait [#allocation3], 128  }
  0x11   :  { %339 = vsyncadd [#allocation3], 4294967168 }
  0x12   :  { %340 = dma.done.wait [#allocation5], 512  }
  0x13   :  { %341 = vsyncadd [#allocation5], 4294966784 }
  0x14   :  { %342 = dma.done.wait [#allocation8], 2112  }
  0x15   :  { %343 = vsyncadd [#allocation8], 4294965184  ;;  %vm101_vm0 = vcmask 64512   ;;  %v98_v0 = vld [vmem:[#allocation6 + $0x8] sm:$0xff]  ;;  %v100_v1 = vld [vmem:[#allocation6 + $0x10] sm:$0xff]  ;;  %vm125_vm1 = vcmask 130048  }
  0x16   :  { %v97_v2 = vld [vmem:[#allocation6] sm:$0xff]  ;;  %143 = vmatpush.msra.mxu1 %v98_v0  ;;  %120 = vmatpush.msra.mxu0 %v100_v1  ;;  %v99_v3 = vld [vmem:[#allocation4] sm:$0xff]  ;;  %v96_v4 = vld [vmem:[#allocation2] sm:$0xff]  ;;  %vm196_vm2 = vcmask 7168  }
  0x17   :  { %v167_v5 = vld [vmem:[#allocation7 + $0x78] sm:$0xff]  ;;  %205 = vmatmul.msk.f32.vlgmr.msra.gmra.mxu0 %vm101_vm0, %v99_v3  ;;  %v166_v6 = vld [vmem:[#allocation7 + $0x70] sm:$0xff]  ;;  %v165_v7 = vld [vmem:[#allocation7 + $0x68] sm:$0xff] }
  0x18   :  { %169 = vmatpush.msra.mxu2 %v167_v5  ;;  %144 = vmatpush.msra.mxu1 %v97_v2  ;;  %v164_v8 = vld [vmem:[#allocation7 + $0x60] sm:$0xff]  ;;  %v163_v9 = vld [vmem:[#allocation7 + $0x58] sm:$0xff]  ;;  %v162_v10 = vld [vmem:[#allocation7 + $0x50] sm:$0xff] }
  0x19   :  { %206 = vmatmul.msk.f32.vlgmr.msra.gmra.mxu1 %vm125_vm1, %v96_v4  ;;  %v161_v11 = vld [vmem:[#allocation7 + $0x48] sm:$0xff]  ;;  %v160_v12 = vld [vmem:[#allocation7 + $0x40] sm:$0xff]  ;;  %v159_v13 = vld [vmem:[#allocation7 + $0x38] sm:$0xff] }
  0x1a   :  { %170 = vmatpush.msra.mxu2 %v166_v6  ;;  %v158_v14 = vld [vmem:[#allocation7 + $0x30] sm:$0xff]  ;;  %v157_v15 = vld [vmem:[#allocation7 + $0x28] sm:$0xff]  ;;  %v156_v16 = vld [vmem:[#allocation7 + $0x20] sm:$0xff] }
  0x1b   :  { %v155_v17 = vld [vmem:[#allocation7 + $0x18] sm:$0xff]  ;;  %v154_v18 = vld [vmem:[#allocation7 + $0x10] sm:$0xff]  ;;  %v153_v19 = vld [vmem:[#allocation7 + $0x8] sm:$0xff] }
  0x1c   :  { %171 = vmatpush.msra.mxu2 %v165_v7  ;;  %v152_v20 = vld [vmem:[#allocation7] sm:$0xff] }
  0x1d   :  { %v214_v22 = vld [vmem:[#allocation9] ss:$0 sm:$0xff]  ;;  %v215_v27 = vld [vmem:[#allocation9 + $0x1] ss:$0 sm:$0xff]  ;;  %v216_v30 = vld [vmem:[#allocation9 + $0x2] ss:$0 sm:$0xff] }
  0x1e   :  { %172 = vmatpush.msra.mxu2 %v164_v8  ;;  %v217_v33 = vld [vmem:[#allocation9 + $0x3] ss:$0 sm:$0xff] }
  0x20   :  { %173 = vmatpush.msra.mxu2 %v163_v9 }
  0x22   :  { %174 = vmatpush.msra.mxu2 %v162_v10 }
  0x24   :  { %175 = vmatpush.msra.mxu2 %v161_v11 }
  0x26   :  { %176 = vmatpush.msra.mxu2 %v160_v12 }
  0x28   :  { %177 = vmatpush.msra.mxu2 %v159_v13 }
  0x2a   :  { %178 = vmatpush.msra.mxu2 %v158_v14 }
  0x2c   :  { %179 = vmatpush.msra.mxu2 %v157_v15 }
  0x2e   :  { %180 = vmatpush.msra.mxu2 %v156_v16 }
  0x30   :  { %181 = vmatpush.msra.mxu2 %v155_v17 }
  0x32   :  { %182 = vmatpush.msra.mxu2 %v154_v18 }
  0x34   :  { %183 = vmatpush.msra.mxu2 %v153_v19 }
  0x36   :  { %184 = vmatpush.msra.mxu2 %v152_v20 }
  0x94   :  { %v122_v21 = vpop.f32.mrf.mxu0 }
  0x96   :  { %v146_v23 = vpop.f32.mrf.mxu1 }
  0x97   :  { %v147_v24 = vadd.f32 %v146_v23, %v122_v21 }
  0x99   :  { %v150_v25 = vadd.f32 %v214_v22, %v147_v24 }
  0x9b   :  { %v151_v26 = vmax.f32 %v150_v25, 0.0 }
  0x9d   :  { %185 = vmatmul.f32.vlgmr.msra.gmra.mxu2 %v151_v26 }
 0x120   :  { %v186_v28 = vpop.f32.mrf.mxu2 }
 0x121   :  { %v187_v29 = vadd.f32 %v215_v27, %v186_v28 }
 0x123   :  { %v189_v31 = vmax.f32 %v187_v29, 0.0 }
 0x125   :  { %v191_v32 = vmul.f32 %v216_v30, %v189_v31 }
 0x127   :  { %192 = vadd.xlane.f32.xlu0 %v191_v32 }
 0x19a   :  { %v193_v34 = vpop.xlane.xlu0 %192 }
 0x19b   :  { %v195_v35 = vadd.f32 %v217_v33, %v193_v34 }
 0x19d   :  { %197 = vst.msk [vmem:[%s404_s5] sm:$0xff] %vm196_vm2, %v195_v35 }
 0x19e   :  { %202 = vsyncpa [#allocation3], 1 }
 0x19f   :  { %203 = vsyncpa [#allocation5], 1 }
 0x1a0   :  { %204 = vsyncpa [#allocation8], 1 }

</bundles_post_ra>
